<compile_context>
chip_gen: v5e
topology: v5e:2x2
jax: 0.10.0
libtpu: 0.0.40
codegen_flags: <defaults>
</compile_context>

<pallas_src>
import jax
import jax.numpy as jnp
from jax.experimental import pallas as pl
from jax.experimental.pallas import tpu as pltpu

_LANES = 128


def _flat_affine_kernel(x_ref, scale_ref, loc_ref, out_ref):
    # x_ref: [TR, 128] row-major flattened theta tile.
    # scale_ref/loc_ref: [1, 128] pre-tiled per-lane affine pattern (sublane
    # broadcast only; no lane broadcast, no XLU traffic).
    x = x_ref[...].astype(jnp.float32)
    out_ref[...] = (x * scale_ref[...] + loc_ref[...]).astype(out_ref.dtype)


def _kb_affine_kernel(x_ref, scale_ref, loc_ref, out_ref):
    # Fallback layout: x_ref [K, TB] (batch on lanes), scale/loc [K, 1].
    x = x_ref[...].astype(jnp.float32)
    out_ref[...] = (x * scale_ref[...] + loc_ref[...]).astype(out_ref.dtype)


def restricted_transform_forward(theta, condition, dims_to_sample, loc, scale,
                                 *, max_rows_per_block=1024, tb=2048):
    """Forward of RestrictedTransformForConditional with an affine transform.

    theta: [B, K] (restricted theta, e.g. multi-chain MCMC batch)
    condition/loc/scale: [D]
    Returns [B, K] (same dtype as theta) == transform(full_theta)[:, dims_to_sample].
    """
    B, K = theta.shape
    D = condition.shape[0]
    assert K == len(dims_to_sample)
    assert len(set(dims_to_sample)) == K          # unique dims (holds in sbi)
    assert all(0 <= d < D for d in dims_to_sample)

    dims = jnp.asarray(dims_to_sample, dtype=jnp.int32)
    # For an elementwise transform, condition drops out of the returned slice:
    #   out[b, k] = scale[dims[k]] * theta[b, k] + loc[dims[k]]
    scale_k = scale[dims].astype(jnp.float32)     # [K]
    loc_k = loc[dims].astype(jnp.float32)         # [K]
    del condition  # no effect on the elementwise-affine forward output

    out_dtype = theta.dtype

    if _LANES % K == 0:
        # ---- Fast path: free row-major flatten to [(B*K)/128, 128]. --------
        group = _LANES // K
        # flat index n = b*K + k; since K | 128, n % K == (n % 128) % K, so a
        # single 128-lane pattern tile(scale_k, 128/K) is exact for every row.
        scale_row = jnp.tile(scale_k, group).reshape(1, _LANES)
        loc_row = jnp.tile(loc_k, group).reshape(1, _LANES)

        total = B * K
        rows = pl.cdiv(total, _LANES)
        flat = theta.reshape(-1)
        pad = rows * _LANES - total
        if pad:   # at most 127 elements; only when B*K is not a 128-multiple
            flat = jnp.pad(flat, (0, pad))
        x2d = flat.reshape(rows, _LANES)

        if rows <= max_rows_per_block:
            tr, grid = rows, (1,)                 # single full-extent block
        else:
            tr, grid = max_rows_per_block, (pl.cdiv(rows, max_rows_per_block),)

        out2d = pl.pallas_call(
            _flat_affine_kernel,
            out_shape=jax.ShapeDtypeStruct((rows, _LANES), out_dtype),
            grid=grid,
            in_specs=[
                pl.BlockSpec((tr, _LANES), lambda i: (i, 0)),   # theta rows
                pl.BlockSpec((1, _LANES), lambda i: (0, 0)),    # scale pattern
                pl.BlockSpec((1, _LANES), lambda i: (0, 0)),    # loc pattern
            ],
            out_specs=pl.BlockSpec((tr, _LANES), lambda i: (i, 0)),
            compiler_params=pltpu.CompilerParams(
                dimension_semantics=("parallel",) if grid[0] > 1
                else ("arbitrary",)),
        )(x2d, scale_row, loc_row)

        out_flat = out2d.reshape(-1)
        if pad:
            out_flat = out_flat[:total]
        return out_flat.reshape(B, K)             # free row-major reshape

    # ---- Fallback (128 % K != 0): batch-on-lanes [K, B] layout. ------------
    theta_t = theta.T                             # [K, B]
    scale_col = scale_k.reshape(K, 1)
    loc_col = loc_k.reshape(K, 1)

    if B <= tb:
        tb_eff, grid = B, (1,)                    # full-extent lane block
    else:
        tb_eff, grid = tb, (pl.cdiv(B, tb),)      # ragged last block is masked

    out_t = pl.pallas_call(
        _kb_affine_kernel,
        out_shape=jax.ShapeDtypeStruct((K, B), out_dtype),
        grid=grid,
        in_specs=[
            pl.BlockSpec((K, tb_eff), lambda i: (0, i)),
            pl.BlockSpec((K, 1), lambda i: (0, 0)),
            pl.BlockSpec((K, 1), lambda i: (0, 0)),
        ],
        out_specs=pl.BlockSpec((K, tb_eff), lambda i: (0, i)),
        compiler_params=pltpu.CompilerParams(
            dimension_semantics=("parallel",) if grid[0] > 1
            else ("arbitrary",)),
    )(theta_t, scale_col, loc_col)
    return out_t.T


def _reference(theta, condition, dims_to_sample, loc, scale):
    """Pure-JAX replica of the original torch forward (full-D path)."""
    B = theta.shape[0]
    dims = jnp.asarray(dims_to_sample)
    full = jnp.tile(condition[None, :], (B, 1))
    full = full.at[:, dims].set(theta)
    tf_full = scale[None, :] * full + loc[None, :]
    return tf_full[:, dims]


if __name__ == "__main__":
    key = jax.random.PRNGKey(0)
    D = 16                           # full theta dimensionality
    dims_to_sample = [0, 3, 7, 12]   # K = 4 (divides 128 -> flattened path)
    K = len(dims_to_sample)
    B = 256                          # batch of theta (e.g. MCMC chains)

    k1, k2, k3, k4 = jax.random.split(key, 4)
    theta = jax.random.normal(k1, (B, K), dtype=jnp.float32)
    condition = jax.random.normal(k2, (D,), dtype=jnp.float32)
    loc = jax.random.normal(k3, (D,), dtype=jnp.float32)
    scale = jax.random.uniform(k4, (D,), dtype=jnp.float32,
                               minval=0.5, maxval=2.0)

    out = restricted_transform_forward(theta, condition, dims_to_sample,
                                       loc, scale)
    out = jax.block_until_ready(out)

    ref = _reference(theta, condition, dims_to_sample, loc, scale)
    assert out.shape == (B, K)
    assert out.dtype == theta.dtype
    assert jnp.allclose(out, ref, atol=1e-5, rtol=1e-5)

    print("KERNEL_OK")
</pallas_src>

<mosaic_0001>
module attributes {stable_mosaic.version = 11 : i64} {
  func.func @_flat_affine_kernel(%arg0: i32, %arg1: memref<8x128xf32, #tpu.memory_space<vmem>>, %arg2: memref<1x128xf32, #tpu.memory_space<vmem>>, %arg3: memref<1x128xf32, #tpu.memory_space<vmem>>, %arg4: memref<8x128xf32, #tpu.memory_space<vmem>>) attributes {dimension_semantics = [#tpu.dimension_semantics<arbitrary>], iteration_bounds = array<i64: 1>, scalar_prefetch = 0 : i64, scratch_operands = 0 : i64, tpu.core_type = #tpu.core_type<tc>, window_params = [{transform_indices = @transform_0, window_bounds = array<i64: 8, 128>}, {pipeline_mode = #tpu.pipeline_mode<synchronous>, transform_indices = @transform_1, window_bounds = array<i64: 1, 128>}, {pipeline_mode = #tpu.pipeline_mode<synchronous>, transform_indices = @transform_2, window_bounds = array<i64: 1, 128>}, {transform_indices = @transform_3, window_bounds = array<i64: 8, 128>}]} {
    %c0 = arith.constant 0 : index
    %c0_0 = arith.constant 0 : index
    %0 = vector.load %arg1[%c0, %c0_0] : memref<8x128xf32, #tpu.memory_space<vmem>>, vector<8x128xf32>
    %c0_1 = arith.constant 0 : index
    %c0_2 = arith.constant 0 : index
    %1 = vector.load %arg2[%c0_1, %c0_2] : memref<1x128xf32, #tpu.memory_space<vmem>>, vector<1x128xf32>
    %2 = vector.broadcast %1 : vector<1x128xf32> to vector<8x128xf32>
    %3 = arith.mulf %0, %2 : vector<8x128xf32>
    %c0_3 = arith.constant 0 : index
    %c0_4 = arith.constant 0 : index
    %4 = vector.load %arg3[%c0_3, %c0_4] : memref<1x128xf32, #tpu.memory_space<vmem>>, vector<1x128xf32>
    %5 = vector.broadcast %4 : vector<1x128xf32> to vector<8x128xf32>
    %6 = arith.addf %3, %5 : vector<8x128xf32>
    %c0_5 = arith.constant 0 : index
    %c0_6 = arith.constant 0 : index
    %7 = vector.load %arg4[%c0_5, %c0_6] : memref<8x128xf32, #tpu.memory_space<vmem>>, vector<8x128xf32>
    tpu.vector_store %arg4[%c0_5, %c0_6], %6 {strides = array<i32>} : memref<8x128xf32, #tpu.memory_space<vmem>>, vector<8x128xf32>,
    return
  }
  func.func @transform_0(%arg0: i32) -> (i32, i32) {
    %c0_i32 = arith.constant 0 : i32
    %c0_i32_0 = arith.constant 0 : i32
    return %arg0, %c0_i32 : i32, i32
  }
  func.func @transform_1(%arg0: i32) -> (i32, i32) {
    %c0_i32 = arith.constant 0 : i32
    %c0_i32_0 = arith.constant 0 : i32
    %c0_i32_1 = arith.constant 0 : i32
    return %c0_i32, %c0_i32_0 : i32, i32
  }
  func.func @transform_2(%arg0: i32) -> (i32, i32) {
    %c0_i32 = arith.constant 0 : i32
    %c0_i32_0 = arith.constant 0 : i32
    %c0_i32_1 = arith.constant 0 : i32
    return %c0_i32, %c0_i32_0 : i32, i32
  }
  func.func @transform_3(%arg0: i32) -> (i32, i32) {
    %c0_i32 = arith.constant 0 : i32
    %c0_i32_0 = arith.constant 0 : i32
    return %arg0, %c0_i32 : i32, i32
  }
}

</mosaic_0001>

<bundles_post_ra>
// kernel: tpu_custom_call.1
= control target key start
LH: loop header
LB: loop body
LE: loop exit
PB: predicated region body
PF: predicated region fallthrough
CT: control target
= control target key end

     0   :  { %8 = vsyncpa [#allocation3], 0  ;;  %s191_s0 = inlined_call_operand.hbm [shape: f32[8,128], index: 0, kind: input, shape index: {}]   ;;  %s192_s1 = inlined_call_operand.hbm [shape: f32[1,128], index: 1, kind: input, shape index: {}]   ;;  %s193_s2 = inlined_call_operand.vmem [shape: f32[1,128], index: 2, kind: input, shape index: {}]   ;;  %s194_s3 = inlined_call_operand.hbm [shape: f32[8,128], index: 3, kind: output, shape index: {}]  }
   0x1   :  { %9 = vsyncpa [#allocation6], 0 }
   0x2   :  { %10 = vsyncpa [#allocation4], 0  ;;  %s16_s14 = sshll.u32 %s191_s0, 4  ;;  %s156_s15 = smov [#allocation2]   ;;  %s17_s14 = int_to_ptr.hbm [resolvable:$true] %s16_s14 }
   0x3   :  { %s18_s16 = sshll.u32 %s156_s15, 4  ;;  %s27_s19 = sshll.u32 %s192_s1, 4  ;;  %s19_s16 = int_to_ptr.vmem [resolvable:$true] %s18_s16  ;;  %s28_s19 = int_to_ptr.hbm [resolvable:$true] %s27_s19 }
   0x4   :  { %21 = dma.hbm_to_vmem [thread:$0]  %s17_s14, 128, %s19_s16, [#allocation3]  }
   0x5   :  { %s157_s20 = smov [#allocation5]  }
   0x6   :  { %s29_s21 = sshll.u32 %s157_s20, 4  ;;  %s30_s21 = int_to_ptr.vmem [resolvable:$true] %s29_s21 }
   0x7   :  { %32 = dma.hbm_to_vmem [thread:$0]  %s28_s19, 16, %s30_s21, [#allocation6]  }
   0x8   :  { %150 = dma.done.wait [#allocation3], 128  }
   0x9   :  { %151 = vsyncadd [#allocation3], 4294967168 }
   0xa   :  { %152 = dma.done.wait [#allocation6], 16  }
   0xb   :  { %153 = vsyncadd [#allocation6], 4294967280  ;;  %v43_v0 = vld [vmem:[#allocation2] sm:$0xff]  ;;  %v76_v1 = vld [vmem:[#allocation5] ss:$0 sm:$0xff]  ;;  %s158_s23 = smov [#allocation7]  }
   0xc   :  { %v77_v2 = vld [vmem:[%s193_s2] ss:$0 sm:$0xff]  ;;  %s60_s24 = sshll.u32 %s158_s23, 4  ;;  %s62_s26 = sshll.u32 %s194_s3, 4  ;;  %v48_v3 = vmul.f32 %v76_v1, %v43_v0  ;;  %s61_s24 = int_to_ptr.vmem [resolvable:$true] %s60_s24  ;;  %s63_s26 = int_to_ptr.hbm [resolvable:$true] %s62_s26 }
   0xe   :  { %v53_v4 = vadd.f32 %v77_v2, %v48_v3 }
  0x10   :  { %54 = vst [vmem:[#allocation7] sm:$0xff] %v53_v4 }
  0x11   :  { %65 = dma.vmem_to_hbm [thread:$0]  %s61_s24, 128, %s63_s26, [#allocation4]  }
  0x12   :  { %154 = dma.done.wait [#allocation4], 128  }
  0x13   :  { %155 = vsyncadd [#allocation4], 4294967168 }
  0x14   :  { %70 = vsyncpa [#allocation3], 1 }
  0x15   :  { %71 = vsyncpa [#allocation6], 1 }
  0x16   :  { %72 = vsyncpa [#allocation4], 1 }

</bundles_post_ra>
